<compile_context>
chip_gen: v7x
topology: tpu7x:2x2x1
jax: 0.10.0
libtpu: 0.0.40
codegen_flags: <defaults>
</compile_context>

<pallas_src>
import math
import jax
import jax.numpy as jnp
from jax import lax
from jax.experimental import pallas as pl
from jax.experimental.pallas import tpu as pltpu

_INV_SQRT2 = 1.0 / math.sqrt(2.0)
_MIB = 1024 * 1024


def _round_up(a, b):
    return (a + b - 1) // b * b


def _hw_config():
    """Per-generation tuning knobs, queried once when the wrapper is built."""
    vmem_cap = 128 * _MIB
    try:
        vmem_cap = int(pltpu.get_tpu_info().vmem_capacity_bytes)
    except Exception:
        pass
    if vmem_cap <= 64 * _MIB:
        # v7x-like: 64 MiB VMEM per TensorCore, 2 TCs per chip, 3.2 TB/s HBM.
        # Keep 2 row tiles (one per TC) and cap scoped VMEM well below physical.
        return dict(
            vmem_limit=max(32 * _MIB, min(52 * _MIB, vmem_cap - 12 * _MIB)),
            th_target=512,
            row_tiles=2,
        )
    # v5e / v6e: 128 MiB VMEM, single TensorCore -> one row tile, big H chunks.
    return dict(
        vmem_limit=min(104 * _MIB, vmem_cap - 24 * _MIB),
        th_target=1024,
        row_tiles=1,
    )


def _pooler_proj_kernel(x_ref, w1_ref, b1_ref, w2_ref, b2_ref, o_ref, acc_ref):
    kh = pl.program_id(1)

    @pl.when(kh == 0)
    def _init():
        acc_ref[...] = jnp.zeros_like(acc_ref)

    # conv-as-matmul for this H-chunk (+ bias), f32 accumulation on the MXU.
    h = jnp.dot(x_ref[...], w1_ref[...], preferred_element_type=jnp.float32)
    h = h + b1_ref[...]
    # exact (erf) GELU in f32, matching PyTorch nn.GELU() default.
    h = 0.5 * h * (1.0 + lax.erf(h * _INV_SQRT2))
    # output linear: accumulate this H-chunk's contribution (bf16 in, f32 acc).
    acc_ref[...] += jnp.dot(h.astype(w2_ref.dtype), w2_ref[...],
                            preferred_element_type=jnp.float32)

    @pl.when(kh == pl.num_programs(1) - 1)
    def _finalize():
        o_ref[...] = (acc_ref[...] + b2_ref[...]).astype(o_ref.dtype)


def _pooler_projector_apply(x, w1, b1, w2, b2, *, hw, ratio, H, K, K_pad, H_pad,
                            th, hwcfg, compute_dtype):
    B, N, C = x.shape
    assert N == hw * hw, (N, hw)
    r = ratio
    ho = hw // r
    M = B * ho * ho
    cdt = compute_dtype
    cdt_b = jnp.dtype(cdt).itemsize
    out_b = jnp.dtype(x.dtype).itemsize

    # ---- glue: im2col patch extraction, feature order (C, ki, kj), in bf16 ----
    xi = x.astype(cdt).reshape(B, ho, r, ho, r, C)   # (B, ho, ki, wo, kj, C)
    xi = xi.transpose(0, 1, 3, 5, 2, 4)              # (B, ho, wo, C, ki, kj)
    x2d = xi.reshape(M, K)

    # ---- row-tile sizing: stream W1/W2 from HBM as few times as possible ----
    # Target: 1 row tile (v5e/v6e) or 2 (one per v7x TensorCore), clamped so the
    # working set fits the scoped-VMEM budget.
    tile_m = _round_up(pl.cdiv(M, hwcfg["row_tiles"]), 8)
    budget = hwcfg["vmem_limit"] - 4 * _MIB          # headroom for Mosaic scratch
    w_bytes = 2 * (K_pad * th + th * H_pad) * cdt_b + 2 * (th + H_pad) * 4

    def _max_tile_m(n_buf):
        per_row = n_buf * K_pad * cdt_b + n_buf * H_pad * out_b + H_pad * 4
        return max(8, (budget - w_bytes) // per_row // 8 * 8)

    n_buf = 2                                        # default double-buffered X/out
    if tile_m > _max_tile_m(2):
        # X and out block indices change only once per row tile; single-buffer
        # them (pl.Buffered(1)) before shrinking the row tile (VMEM-tight v7x).
        n_buf = 1
    tile_m = min(tile_m, _max_tile_m(n_buf))
    M_pad = _round_up(M, tile_m)

    x2d = jnp.pad(x2d, ((0, M_pad - M), (0, K_pad - K)))

    grid = (M_pad // tile_m, H_pad // th)

    def _row_spec(shape, index_map):
        if n_buf == 1:
            return pl.BlockSpec(shape, index_map, pipeline_mode=pl.Buffered(1))
        return pl.BlockSpec(shape, index_map)

    cost = pl.CostEstimate(
        flops=2 * M_pad * K_pad * H_pad + 2 * M_pad * H_pad * H_pad,
        transcendentals=M_pad * H_pad,
        bytes_accessed=(M_pad * K_pad * cdt_b
                        + M_pad * H_pad * out_b
                        + grid[0] * (K_pad * H_pad + H_pad * H_pad) * cdt_b),
    )

    out2d = pl.pallas_call(
        _pooler_proj_kernel,
        out_shape=jax.ShapeDtypeStruct((M_pad, H_pad), x.dtype),
        grid_spec=pltpu.PrefetchScalarGridSpec(
            num_scalar_prefetch=0,
            grid=grid,
            in_specs=[
                _row_spec((tile_m, K_pad), lambda i, j: (i, 0)),     # X row tile
                pl.BlockSpec((K_pad, th), lambda i, j: (0, j)),      # W1 H-chunk
                pl.BlockSpec((1, th), lambda i, j: (0, j)),          # conv bias
                pl.BlockSpec((th, H_pad), lambda i, j: (j, 0)),      # W2 row-chunk
                pl.BlockSpec((1, H_pad), lambda i, j: (0, 0)),       # linear bias
            ],
            out_specs=_row_spec((tile_m, H_pad), lambda i, j: (i, 0)),
            scratch_shapes=[pltpu.VMEM((tile_m, H_pad), jnp.float32)],
        ),
        compiler_params=pltpu.CompilerParams(
            dimension_semantics=("parallel", "arbitrary"),
            vmem_limit_bytes=hwcfg["vmem_limit"],
        ),
        cost_estimate=cost,
    )(x2d, w1, b1, w2, b2)

    return out2d[:M, :H].reshape(B, ho * ho, H)


def make_pooler_projector(conv_w, conv_b, lin_w, lin_b, *, hw, ratio,
                          compute_dtype=jnp.bfloat16):
    """Prepare (transpose / cast / pad) the weights ONCE, at parameter-load
    time, and return a jitted forward:
        x: (B, hw*hw, C_mm) -> (B, (hw//ratio)**2, hidden_size)
    conv_w: (H, C_mm, r, r), conv_b: (H,), lin_w: (H, H) PyTorch (out, in),
    lin_b: (H,)."""
    H, C = int(conv_w.shape[0]), int(conv_w.shape[1])
    r = ratio
    K = C * r * r
    hwcfg = _hw_config()

    # H chunk size: pad H up to a multiple of th instead of shrinking th.
    th = min(hwcfg["th_target"], _round_up(H, 128))
    H_pad = _round_up(H, th)
    K_pad = _round_up(K, 128)

    # ---- one-time weight relayout (NOT in the per-call path) ----
    w1 = jnp.pad(jnp.asarray(conv_w).reshape(H, K).T.astype(compute_dtype),
                 ((0, K_pad - K), (0, H_pad - H)))                   # (K_pad, H_pad)
    w2 = jnp.pad(jnp.asarray(lin_w).T.astype(compute_dtype),
                 ((0, H_pad - H), (0, H_pad - H)))                   # (H_pad, H_pad)
    b1 = jnp.pad(jnp.asarray(conv_b).astype(jnp.float32)[None, :],
                 ((0, 0), (0, H_pad - H)))                           # (1, H_pad)
    b2 = jnp.pad(jnp.asarray(lin_b).astype(jnp.float32)[None, :],
                 ((0, 0), (0, H_pad - H)))                           # (1, H_pad)

    @jax.jit
    def _apply(x, w1_, b1_, w2_, b2_):
        return _pooler_projector_apply(
            x, w1_, b1_, w2_, b2_, hw=hw, ratio=ratio, H=H, K=K,
            K_pad=K_pad, H_pad=H_pad, th=th, hwcfg=hwcfg,
            compute_dtype=compute_dtype)

    def forward(x):
        return _apply(x, w1, b1, w2, b2)

    return forward


def _reference(x, conv_w, conv_b, lin_w, lin_b, *, hw, ratio):
    """Pure-JAX f32 reference reproducing the PyTorch forward."""
    B, N, C = x.shape
    r = ratio
    H = conv_w.shape[0]
    xn = x.reshape(B, hw, hw, C).transpose(0, 3, 1, 2)          # NCHW
    xp = xn.reshape(B, C, hw // r, r, hw // r, r)
    xp = xp.transpose(0, 2, 4, 1, 3, 5).reshape(B, (hw // r) ** 2, C * r * r)
    y = xp @ conv_w.reshape(H, C * r * r).T + conv_b
    y = 0.5 * y * (1.0 + lax.erf(y / math.sqrt(2.0)))
    y = y @ lin_w.T + lin_b
    return y


if __name__ == "__main__":
    # Small synthetic config: image_size=16, patch_size=2 -> hw=8; ratio=2
    # mm_hidden_size=32, hidden_size=64, batch=2.
    B, hw, ratio = 2, 8, 2
    C_mm, H = 32, 64

    key = jax.random.PRNGKey(0)
    k_x, k_cw, k_cb, k_lw, k_lb = jax.random.split(key, 5)

    x = jax.random.normal(k_x, (B, hw * hw, C_mm), dtype=jnp.float32)
    conv_w = jax.random.normal(k_cw, (H, C_mm, ratio, ratio), dtype=jnp.float32) * 0.05
    conv_b = jax.random.normal(k_cb, (H,), dtype=jnp.float32) * 0.05
    lin_w = jax.random.normal(k_lw, (H, H), dtype=jnp.float32) * 0.05
    lin_b = jax.random.normal(k_lb, (H,), dtype=jnp.float32) * 0.05

    # Weights are prepared once here (parameter-load time); forward is jitted.
    forward = make_pooler_projector(conv_w, conv_b, lin_w, lin_b, hw=hw, ratio=ratio)
    out = jax.block_until_ready(forward(x))

    ref = _reference(x, conv_w, conv_b, lin_w, lin_b, hw=hw, ratio=ratio)
    assert out.shape == (B, (hw // ratio) ** 2, H), out.shape
    # bf16 matmul inputs / bf16-rounded GELU activation with f32 accumulation
    # -> compare against the f32 reference at bf16-level tolerance.
    max_err = float(jnp.abs(out - ref).max())
    assert jnp.allclose(out, ref, atol=8e-2, rtol=8e-2), max_err

    print("KERNEL_OK")
</pallas_src>

<mosaic_0001>
module attributes {stable_mosaic.version = 11 : i64} {
  func.func @_pooler_proj_kernel(%arg0: i32, %arg1: i32, %arg2: memref<32x128xbf16, #tpu.memory_space<vmem>>, %arg3: memref<128x128xbf16, #tpu.memory_space<vmem>>, %arg4: memref<1x128xf32, #tpu.memory_space<vmem>>, %arg5: memref<128x128xbf16, #tpu.memory_space<vmem>>, %arg6: memref<1x128xf32, #tpu.memory_space<vmem>>, %arg7: memref<32x128xf32, #tpu.memory_space<vmem>>, %arg8: memref<32x128xf32, #tpu.memory_space<vmem>>) attributes {dimension_semantics = [#tpu.dimension_semantics<parallel>, #tpu.dimension_semantics<arbitrary>], iteration_bounds = array<i64: 1, 1>, scalar_prefetch = 0 : i64, scratch_operands = 1 : i64, tpu.core_type = #tpu.core_type<tc>, window_params = [{transform_indices = @transform_0, window_bounds = array<i64: 32, 128>}, {transform_indices = @transform_1, window_bounds = array<i64: 128, 128>}, {transform_indices = @transform_2, window_bounds = array<i64: 1, 128>}, {transform_indices = @transform_3, window_bounds = array<i64: 128, 128>}, {pipeline_mode = #tpu.pipeline_mode<synchronous>, transform_indices = @transform_4, window_bounds = array<i64: 1, 128>}, {transform_indices = @transform_5, window_bounds = array<i64: 32, 128>}]} {
    %c0_i32 = arith.constant 0 : i32
    %0 = arith.cmpi eq, %arg1, %c0_i32 : i32
    %1 = arith.extui %0 : i1 to i32
    %c0_i32_0 = arith.constant 0 : i32
    %2 = arith.cmpi ne, %1, %c0_i32_0 : i32
    scf.if %2 {
      %cst_18 = arith.constant 0.000000e+00 : f32
      %26 = vector.broadcast %cst_18 : f32 to vector<32x128xf32>
      %c0_19 = arith.constant 0 : index
      %c0_20 = arith.constant 0 : index
      %27 = vector.load %arg8[%c0_19, %c0_20] : memref<32x128xf32, #tpu.memory_space<vmem>>, vector<32x128xf32>
      tpu.vector_store %arg8[%c0_19, %c0_20], %26 {strides = array<i32>} : memref<32x128xf32, #tpu.memory_space<vmem>>, vector<32x128xf32>,
    } else {
    }
    %c0 = arith.constant 0 : index
    %c0_1 = arith.constant 0 : index
    %3 = vector.load %arg2[%c0, %c0_1] : memref<32x128xbf16, #tpu.memory_space<vmem>>, vector<32x128xbf16>
    %c0_2 = arith.constant 0 : index
    %c0_3 = arith.constant 0 : index
    %4 = vector.load %arg3[%c0_2, %c0_3] : memref<128x128xbf16, #tpu.memory_space<vmem>>, vector<128x128xbf16>
    %cst = arith.constant dense<0.000000e+00> : vector<32x128xf32>
    %5 = tpu.matmul %3, %4, %cst {dimension_numbers = #tpu.dot_dimension_numbers<[1], [0], [0], [1], [0, 0, 1, 1], [], []>} : vector<32x128xbf16>, vector<128x128xbf16>, vector<32x128xf32> -> vector<32x128xf32>
    %c0_4 = arith.constant 0 : index
    %c0_5 = arith.constant 0 : index
    %6 = vector.load %arg4[%c0_4, %c0_5] : memref<1x128xf32, #tpu.memory_space<vmem>>, vector<1x128xf32>
    %7 = vector.broadcast %6 : vector<1x128xf32> to vector<32x128xf32>
    %8 = arith.addf %5, %7 : vector<32x128xf32>
    %cst_6 = arith.constant 5.000000e-01 : f32
    %9 = vector.broadcast %cst_6 : f32 to vector<32x128xf32>
    %10 = arith.mulf %9, %8 : vector<32x128xf32>
    %cst_7 = arith.constant 0.707106769 : f32
    %11 = vector.broadcast %cst_7 : f32 to vector<32x128xf32>
    %12 = arith.mulf %8, %11 : vector<32x128xf32>
    %13 = math.erf %12 : vector<32x128xf32>
    %cst_8 = arith.constant 1.000000e+00 : f32
    %14 = vector.broadcast %cst_8 : f32 to vector<32x128xf32>
    %15 = arith.addf %14, %13 : vector<32x128xf32>
    %16 = arith.mulf %10, %15 : vector<32x128xf32>
    %c0_9 = arith.constant 0 : index
    %c0_10 = arith.constant 0 : index
    %17 = vector.load %arg8[%c0_9, %c0_10] : memref<32x128xf32, #tpu.memory_space<vmem>>, vector<32x128xf32>
    %18 = arith.truncf %16 : vector<32x128xf32> to vector<32x128xbf16>
    %c0_11 = arith.constant 0 : index
    %c0_12 = arith.constant 0 : index
    %19 = vector.load %arg5[%c0_11, %c0_12] : memref<128x128xbf16, #tpu.memory_space<vmem>>, vector<128x128xbf16>
    %cst_13 = arith.constant dense<0.000000e+00> : vector<32x128xf32>
    %20 = tpu.matmul %18, %19, %cst_13 {dimension_numbers = #tpu.dot_dimension_numbers<[1], [0], [0], [1], [0, 0, 1, 1], [], []>} : vector<32x128xbf16>, vector<128x128xbf16>, vector<32x128xf32> -> vector<32x128xf32>
    %21 = arith.addf %17, %20 : vector<32x128xf32>
    %c0_14 = arith.constant 0 : index
    %c0_15 = arith.constant 0 : index
    %22 = vector.load %arg8[%c0_14, %c0_15] : memref<32x128xf32, #tpu.memory_space<vmem>>, vector<32x128xf32>
    tpu.vector_store %arg8[%c0_14, %c0_15], %21 {strides = array<i32>} : memref<32x128xf32, #tpu.memory_space<vmem>>, vector<32x128xf32>,
    %c0_i32_16 = arith.constant 0 : i32
    %23 = arith.cmpi eq, %arg1, %c0_i32_16 : i32
    %24 = arith.extui %23 : i1 to i32
    %c0_i32_17 = arith.constant 0 : i32
    %25 = arith.cmpi ne, %24, %c0_i32_17 : i32
    scf.if %25 {
      %c0_18 = arith.constant 0 : index
      %c0_19 = arith.constant 0 : index
      %26 = vector.load %arg8[%c0_18, %c0_19] : memref<32x128xf32, #tpu.memory_space<vmem>>, vector<32x128xf32>
      %c0_20 = arith.constant 0 : index
      %c0_21 = arith.constant 0 : index
      %27 = vector.load %arg6[%c0_20, %c0_21] : memref<1x128xf32, #tpu.memory_space<vmem>>, vector<1x128xf32>
      %28 = vector.broadcast %27 : vector<1x128xf32> to vector<32x128xf32>
      %29 = arith.addf %26, %28 : vector<32x128xf32>
      %c0_22 = arith.constant 0 : index
      %c0_23 = arith.constant 0 : index
      %30 = vector.load %arg7[%c0_22, %c0_23] : memref<32x128xf32, #tpu.memory_space<vmem>>, vector<32x128xf32>
      tpu.vector_store %arg7[%c0_22, %c0_23], %29 {strides = array<i32>} : memref<32x128xf32, #tpu.memory_space<vmem>>, vector<32x128xf32>,
    } else {
    }
    return
  }
  func.func @transform_0(%arg0: i32, %arg1: i32) -> (i32, i32) {
    %c0_i32 = arith.constant 0 : i32
    %c0_i32_0 = arith.constant 0 : i32
    return %arg0, %c0_i32 : i32, i32
  }
  func.func @transform_1(%arg0: i32, %arg1: i32) -> (i32, i32) {
    %c0_i32 = arith.constant 0 : i32
    %c0_i32_0 = arith.constant 0 : i32
    return %c0_i32, %arg1 : i32, i32
  }
  func.func @transform_2(%arg0: i32, %arg1: i32) -> (i32, i32) {
    %c0_i32 = arith.constant 0 : i32
    %c0_i32_0 = arith.constant 0 : i32
    return %c0_i32, %arg1 : i32, i32
  }
  func.func @transform_3(%arg0: i32, %arg1: i32) -> (i32, i32) {
    %c0_i32 = arith.constant 0 : i32
    %c0_i32_0 = arith.constant 0 : i32
    return %arg1, %c0_i32 : i32, i32
  }
  func.func @transform_4(%arg0: i32, %arg1: i32) -> (i32, i32) {
    %c0_i32 = arith.constant 0 : i32
    %c0_i32_0 = arith.constant 0 : i32
    %c0_i32_1 = arith.constant 0 : i32
    return %c0_i32, %c0_i32_0 : i32, i32
  }
  func.func @transform_5(%arg0: i32, %arg1: i32) -> (i32, i32) {
    %c0_i32 = arith.constant 0 : i32
    %c0_i32_0 = arith.constant 0 : i32
    return %arg0, %c0_i32 : i32, i32
  }
}

</mosaic_0001>

<bundles_post_ra>
// kernel: _apply.1
= control target key start
LH: loop header
LB: loop body
LE: loop exit
PB: predicated region body
PF: predicated region fallthrough
CT: control target
= control target key end

     0   :  { %10 = vsyncpa [#allocation4], 0  ;;  %s802_s0 = inlined_call_operand.hbm [shape: bf16[32,128], index: 0, kind: input, shape index: {}]   ;;  %s803_s1 = inlined_call_operand.hbm [shape: bf16[128,128], index: 1, kind: input, shape index: {}]   ;;  %s804_s2 = inlined_call_operand.hbm [shape: f32[1,128], index: 2, kind: input, shape index: {}]   ;;  %s805_s3 = inlined_call_operand.hbm [shape: bf16[128,128], index: 3, kind: input, shape index: {}]   ;;  %s806_s4 = inlined_call_operand.hbm [shape: f32[1,128], index: 4, kind: input, shape index: {}]   ;;  %s807_s5 = inlined_call_operand.hbm [shape: f32[32,128], index: 5, kind: output, shape index: {}]  }
   0x1   :  { %11 = vsyncpa [#allocation7], 0 }
   0x2   :  { %12 = vsyncpa [#allocation10], 0 }
   0x3   :  { %13 = vsyncpa [#allocation5], 0  ;;  %s674_s18 = smov [#allocation6]   ;;  %s675_s20 = smov [#allocation9]  }
   0x4   :  { %s31_s19 = sshll.u32 %s674_s18, 4  ;;  %s53_s21 = sshll.u32 %s675_s20, 4  ;;  %s32_s19 = int_to_ptr.vmem [resolvable:$true] %s31_s19  ;;  %s714_s21 = int_to_ptr.vmem [resolvable:$true] %s53_s21 }
   0x5   :  { %s534_s24 = scalar_lea.hbm %s803_s1, 1024 }
   0x6   :  { %p535_p0 = scmp.ne.s32.totalorder %s803_s1, %s534_s24  ;;  %p538_p1 = scmp.lt.u32.totalorder %s534_s24, %s803_s1 }
   0x8   :  { %p540_p2 = pnand %p538_p1, %p535_p0 }
   0xa   :  { %543 = shalt.err (!%p540_p2)
}
   0xb   :  { %s544_s29 = scalar_lea.vmem %s32_s19, 1024  ;;  %p549_p4 = scmp.lt.s32.totalorder %s32_s19, %s32_s19 }
   0xc   :  { %p545_p3 = scmp.ne.s32.totalorder %s32_s19, %s544_s29  ;;  %p550_p5 = scmp.lt.s32.totalorder %s544_s29, %s544_s29 }
   0xe   :  { %p551_p6 = por %p550_p5, %p549_p4 }
  0x10   :  { %p552_p7 = pnand %p551_p6, %p545_p3 }
  0x12   :  { %555 = shalt.err (!%p552_p7)
}
  0x13   :  { %s676_s30 = smov 64   ;;  %s677_s6 = smov 4  }
  0x14   :  { %37 = dma.hbm_to_vmem [thread:$0]  %s803_s1, 1024, %s32_s19, [#allocation7], %s676_s30, %s676_s30, %s677_s6  }
  0x15   :  { %s556_s11 = scalar_lea.hbm %s805_s3, 1024 }
  0x16   :  { %p557_p8 = scmp.ne.s32.totalorder %s805_s3, %s556_s11  ;;  %p560_p9 = scmp.lt.u32.totalorder %s556_s11, %s805_s3 }
  0x18   :  { %p562_p10 = pnand %p560_p9, %p557_p8 }
  0x1a   :  { %565 = shalt.err (!%p562_p10)
}
  0x1b   :  { %s566_s16 = scalar_lea.vmem %s714_s21, 1024  ;;  %p571_p12 = scmp.lt.s32.totalorder %s714_s21, %s714_s21 }
  0x1c   :  { %p567_p11 = scmp.ne.s32.totalorder %s714_s21, %s566_s16  ;;  %p572_p13 = scmp.lt.s32.totalorder %s566_s16, %s566_s16 }
  0x1e   :  { %p573_p0 = por %p572_p13, %p571_p12 }
  0x20   :  { %p574_p1 = pnand %p573_p0, %p567_p11 }
  0x22   :  { %577 = shalt.err (!%p574_p1)
}
  0x23   :  { %59 = dma.hbm_to_vmem [thread:$0]  %s805_s3, 1024, %s714_s21, [#allocation10], %s676_s30, %s676_s30, %s677_s6  }
  0x24   :  { %s678_s18 = smov [#allocation3]   ;;  %s679_s20 = smov [#allocation8]  }
  0x25   :  { %s19_s19 = sshll.u32 %s678_s18, 4  ;;  %s44_s22 = sshll.u32 %s679_s20, 4  ;;  %s20_s19 = int_to_ptr.vmem [resolvable:$true] %s19_s19  ;;  %s45_s22 = int_to_ptr.vmem [resolvable:$true] %s44_s22 }
  0x26   :  { %s578_s25 = scalar_lea.hbm %s802_s0, 256 }
  0x27   :  { %p579_p2 = scmp.ne.s32.totalorder %s802_s0, %s578_s25  ;;  %p582_p3 = scmp.lt.u32.totalorder %s578_s25, %s802_s0 }
  0x29   :  { %p584_p4 = pnand %p582_p3, %p579_p2 }
  0x2b   :  { %587 = shalt.err (!%p584_p4)
}
  0x2c   :  { %s588_s3 = scalar_lea.vmem %s20_s19, 256  ;;  %p593_p6 = scmp.lt.s32.totalorder %s20_s19, %s20_s19 }
  0x2d   :  { %p589_p5 = scmp.ne.s32.totalorder %s20_s19, %s588_s3  ;;  %p594_p7 = scmp.lt.s32.totalorder %s588_s3, %s588_s3 }
  0x2f   :  { %p595_p8 = por %p594_p7, %p593_p6 }
  0x31   :  { %p596_p9 = pnand %p595_p8, %p589_p5 }
  0x33   :  { %599 = shalt.err (!%p596_p9)
}
  0x34   :  { %25 = dma.hbm_to_vmem [thread:$0]  %s802_s0, 256, %s20_s19, [#allocation4], %s676_s30, %s676_s30, %s677_s6  }
  0x35   :  { %s600_s10 = scalar_lea.hbm %s804_s2, 16 }
  0x36   :  { %p601_p10 = scmp.ne.s32.totalorder %s804_s2, %s600_s10  ;;  %p604_p11 = scmp.lt.u32.totalorder %s600_s10, %s804_s2 }
  0x38   :  { %p606_p12 = pnand %p604_p11, %p601_p10 }
  0x3a   :  { %609 = shalt.err (!%p606_p12)
}
  0x3b   :  { %s610_s15 = scalar_lea.vmem %s45_s22, 16  ;;  %s614_s16 = scalar_lea.vmem %s45_s22, 32 }
  0x3c   :  { %p611_p13 = scmp.ne.s32.totalorder %s45_s22, %s610_s15  ;;  %p615_p0 = scmp.lt.s32.totalorder %s45_s22, %s45_s22 }
  0x3d   :  { %p616_p1 = scmp.lt.s32.totalorder %s614_s16, %s610_s15 }
  0x3f   :  { %p617_p2 = por %p616_p1, %p615_p0 }
  0x41   :  { %p618_p3 = pnand %p617_p2, %p611_p13 }
  0x43   :  { %621 = shalt.err (!%p618_p3)
}
  0x44   :  { %47 = dma.hbm_to_vmem [thread:$0]  %s804_s2, 16, %s45_s22, [#allocation7]  }
  0x45   :  { %s680_s6 = smov [#allocation11]   ;;  %s622_s19 = scalar_lea.hbm %s806_s4, 16 }
  0x46   :  { %s66_s1 = sshll.u32 %s680_s6, 4  ;;  %p623_p4 = scmp.ne.s32.totalorder %s806_s4, %s622_s19  ;;  %s67_s1 = int_to_ptr.vmem [resolvable:$true] %s66_s1 }
  0x47   :  { %p626_p5 = scmp.lt.u32.totalorder %s622_s19, %s806_s4 }
  0x49   :  { %p628_p6 = pnand %p626_p5, %p623_p4 }
  0x4b   :  { %631 = shalt.err (!%p628_p6)
}
  0x4c   :  { %s632_s26 = scalar_lea.vmem %s67_s1, 16  ;;  %s636_s2 = scalar_lea.vmem %s67_s1, 32 }
  0x4d   :  { %p633_p7 = scmp.ne.s32.totalorder %s67_s1, %s632_s26  ;;  %p637_p8 = scmp.lt.s32.totalorder %s67_s1, %s67_s1 }
  0x4e   :  { %p638_p9 = scmp.lt.s32.totalorder %s636_s2, %s632_s26 }
  0x50   :  { %p639_p10 = por %p638_p9, %p637_p8 }
  0x52   :  { %p640_p11 = pnand %p639_p10, %p633_p7 }
  0x54   :  { %643 = shalt.err (!%p640_p11)
}
  0x55   :  { %69 = dma.hbm_to_vmem [thread:$0]  %s806_s4, 16, %s67_s1, [#allocation10]  }
  0x56   :  { %666 = dma.done.wait [#allocation4], 256  }
  0x57   :  { %667 = vsyncadd [#allocation4], 4294967040 }
  0x58   :  { %668 = dma.done.wait [#allocation7], 1040  }
  0x59   :  { %669 = vsyncadd [#allocation7], 4294966256 }
  0x5a   :  { %670 = dma.done.wait [#allocation10], 1040  }
  0x5b   :  { %671 = vsyncadd [#allocation10], 4294966256  ;;  %v508_v0 = vld [vmem:[#allocation6] sm:$0xff]   ;;  %v509_v1 = vld [vmem:[#allocation6 + $0x8] sm:$0xff]   ;;  %s681_s4 = smov [#allocation12]  }
  0x5c   :  { %458 = vmatprep.subr.bf16.mxu0 %v508_v0  ;;  %v510_v2 = vld [vmem:[#allocation6 + $0x10] sm:$0xff]   ;;  %v511_v3 = vld [vmem:[#allocation6 + $0x18] sm:$0xff]   ;;  %v512_v5 = vld [vmem:[#allocation6 + $0x20] sm:$0xff]   ;;  %s404_s28 = sshll.u32 %s681_s4, 4  ;;  %s405_s28 = int_to_ptr.vmem [resolvable:$true] %s404_s28 }
  0x5d   :  { %459 = vmatpush3.bf16.msra.mxu0 %v508_v0  ;;  %v516_v4 = vld [vmem:[#allocation3] sm:$0xff]   ;;  %v518_v6 = vld [vmem:[#allocation9] sm:$0xff]   ;;  %v515_v10 = vld [vmem:[#allocation6 + $0x38] sm:$0xff]   ;;  %s644_s29 = scalar_lea.vmem %s405_s28, 512  ;;  %p649_p13 = scmp.lt.s32.totalorder %s405_s28, %s405_s28 }
  0x5e   :  { %460 = vmatprep.subr.bf16.mxu0 %v509_v1  ;;  %474 = vmatprep.mubr.bf16.mxu0 %v516_v4  ;;  %v519_v7 = vld [vmem:[#allocation9 + $0x8] sm:$0xff]   ;;  %v517_v11 = vld [vmem:[#allocation3 + $0x8] sm:$0xff]   ;;  %v522_v14 = vld [vmem:[#allocation9 + $0x20] sm:$0xff]   ;;  %p645_p12 = scmp.ne.s32.totalorder %s405_s28, %s644_s29  ;;  %p650_p0 = scmp.lt.s32.totalorder %s644_s29, %s644_s29 }
  0x5f   :  { %478 = vmatprep.subr.bf16.mxu1 %v518_v6  ;;  %v513_v8 = vld [vmem:[#allocation6 + $0x28] sm:$0xff]   ;;  %v514_v9 = vld [vmem:[#allocation6 + $0x30] sm:$0xff]   ;;  %v521_v13 = vld [vmem:[#allocation9 + $0x18] sm:$0xff]  }
  0x60   :  { %479 = vmatpush3.bf16.msra.mxu1 %v518_v6  ;;  %v520_v12 = vld [vmem:[#allocation9 + $0x10] sm:$0xff]   ;;  %v523_v15 = vld [vmem:[#allocation9 + $0x28] sm:$0xff]   ;;  %v525_v17 = vld [vmem:[#allocation9 + $0x38] sm:$0xff]   ;;  %p651_p1 = por %p650_p0, %p649_p13 }
  0x61   :  { %461 = vmatpush3.bf16.msra.mxu0 %v509_v1  ;;  %480 = vmatprep.subr.bf16.mxu1 %v519_v7  ;;  %v524_v16 = vld [vmem:[#allocation9 + $0x30] sm:$0xff]   ;;  %v418_v18 = vld [vmem:[#allocation8] ss:$0 sm:$0xff]  ;;  %v437_v49 = vld [vmem:[#allocation11] ss:$0 sm:$0xff] }
  0x62   :  { %462 = vmatprep.subr.bf16.mxu0 %v510_v2  ;;  %p652_p2 = pnand %p651_p1, %p645_p12 }
  0x64   :  { %481 = vmatpush3.bf16.msra.mxu1 %v519_v7 }
  0x65   :  { %463 = vmatpush3.bf16.msra.mxu0 %v510_v2  ;;  %482 = vmatprep.subr.bf16.mxu1 %v520_v12 }
  0x66   :  { %464 = vmatprep.subr.bf16.mxu0 %v511_v3 }
  0x68   :  { %483 = vmatpush3.bf16.msra.mxu1 %v520_v12 }
  0x69   :  { %465 = vmatpush3.bf16.msra.mxu0 %v511_v3  ;;  %484 = vmatprep.subr.bf16.mxu1 %v521_v13 }
  0x6a   :  { %466 = vmatprep.subr.bf16.mxu0 %v512_v5 }
  0x6c   :  { %485 = vmatpush3.bf16.msra.mxu1 %v521_v13 }
  0x6d   :  { %467 = vmatpush3.bf16.msra.mxu0 %v512_v5  ;;  %486 = vmatprep.subr.bf16.mxu1 %v522_v14 }
  0x6e   :  { %468 = vmatprep.subr.bf16.mxu0 %v513_v8 }
  0x70   :  { %487 = vmatpush3.bf16.msra.mxu1 %v522_v14 }
  0x71   :  { %469 = vmatpush3.bf16.msra.mxu0 %v513_v8  ;;  %488 = vmatprep.subr.bf16.mxu1 %v523_v15 }
  0x72   :  { %470 = vmatprep.subr.bf16.mxu0 %v514_v9 }
  0x74   :  { %489 = vmatpush3.bf16.msra.mxu1 %v523_v15 }
  0x75   :  { %471 = vmatpush3.bf16.msra.mxu0 %v514_v9  ;;  %490 = vmatprep.subr.bf16.mxu1 %v524_v16 }
  0x76   :  { %472 = vmatprep.subr.bf16.mxu0 %v515_v10 }
  0x78   :  { %491 = vmatpush3.bf16.msra.mxu1 %v524_v16 }
  0x79   :  { %473 = vmatpush3.bf16.msra.mxu0 %v515_v10  ;;  %492 = vmatprep.subr.bf16.mxu1 %v525_v17 }
  0x7c   :  { %475 = vmatmul.mubr.bf16.vlgmr.msra.gmra.mrb[0].mxu0 %v517_v11  ;;  %493 = vmatpush3.bf16.msra.mxu1 %v525_v17 }
 0x14f   :  { %v476_v19 = vpop.f32.mrb[0].mxu0 }
 0x150   :  { %v224_v20 = vadd.f32 %v476_v19, %v418_v18  ;;  %v215_v21 = vpop.f32.mrb[1].mxu0 }
 0x151   :  { %v216_v22 = vadd.f32 %v418_v18, %v215_v21  ;;  %v477_v23 = vpop.f32.mrb[2].mxu0 }
 0x152   :  { %v236_v24 = vmul.f32 0.70710677, %v224_v20  ;;  %v227_v25 = vadd.f32 %v477_v23, %v418_v18  ;;  %v218_v26 = vpop.f32.mrb[3].mxu0  ;;  %v232_v37 = vmul.f32 0.5, %v224_v20 }
 0x153   :  { %v234_v27 = vmul.f32 0.70710677, %v216_v22  ;;  %v219_v28 = vadd.f32 %v418_v18, %v218_v26  ;;  %v230_v40 = vmul.f32 0.5, %v216_v22 }
 0x154   :  { %526 = verf.f32 %v236_v24  ;;  %v237_v29 = vmul.f32 0.70710677, %v227_v25  ;;  %v233_v38 = vmul.f32 0.5, %v227_v25 }
 0x155   :  { %528 = verf.f32 %v234_v27  ;;  %v235_v30 = vmul.f32 0.70710677, %v219_v28  ;;  %v231_v41 = vmul.f32 0.5, %v219_v28 }
 0x156   :  { %530 = verf.f32 %v237_v29 }
 0x157   :  { %532 = verf.f32 %v235_v30 }
 0x15e   :  { %v527_v31 = vpop.eup %526 }
 0x15f   :  { %v529_v32 = vpop.eup %528  ;;  %v244_v33 = vadd.f32 1.0, %v527_v31 }
 0x160   :  { %v531_v34 = vpop.eup %530  ;;  %v242_v35 = vadd.f32 1.0, %v529_v32 }
 0x161   :  { %v533_v36 = vpop.eup %532  ;;  %v245_v39 = vadd.f32 1.0, %v531_v34  ;;  %v248_v43 = vmul.f32 %v244_v33, %v232_v37 }
 0x162   :  { %v243_v42 = vadd.f32 1.0, %v533_v36  ;;  %v246_v45 = vmul.f32 %v242_v35, %v230_v40 }
 0x163   :  { %v249_v44 = vmul.f32 %v245_v39, %v233_v38 }
 0x164   :  { %v247_v46 = vmul.f32 %v243_v42, %v231_v41 }
 0x165   :  { %v255_v47 = vpack.c.bf16 %v249_v44, %v248_v43 }
 0x166   :  { %v254_v48 = vpack.c.bf16 %v247_v46, %v246_v45 }
 0x168   :  { %494 = vmatprep.mubr.bf16.mxu1 %v254_v48 }
 0x169   :  { %495 = vmatmul.mubr.bf16.vlgmr.msra.gmra.mrb[0].mxu1 %v255_v47 }
 0x23c   :  { %v496_v50 = vpop.f32.mrb[0].mxu1 }
 0x23d   :  { %v393_v51 = vadd.f32 %v496_v50, %v437_v49  ;;  %v354_v52 = vpop.f32.mrb[1].mxu1 }
 0x23e   :  { %v391_v53 = vadd.f32 %v437_v49, %v354_v52  ;;  %v497_v54 = vpop.f32.mrb[2].mxu1 }
 0x23f   :  { %397 = vst [vmem:[#allocation12 + $0x10] sm:$0xff] %v393_v51  ;;  %v394_v55 = vadd.f32 %v497_v54, %v437_v49  ;;  %v357_v56 = vpop.f32.mrb[3].mxu1 }
 0x240   :  { %395 = vst [vmem:[#allocation12] sm:$0xff] %v391_v53  ;;  %v392_v57 = vadd.f32 %v437_v49, %v357_v56 }
 0x241   :  { %398 = vst [vmem:[#allocation12 + $0x18] sm:$0xff] %v394_v55 }
 0x242   :  { %396 = vst [vmem:[#allocation12 + $0x8] sm:$0xff] %v392_v57 }
 0x243   :  { %655 = shalt.err (!%p652_p2)
}
 0x244   :  { %s656_s7 = scalar_lea.hbm %s807_s5, 512 }
 0x245   :  { %p657_p3 = scmp.ne.s32.totalorder %s807_s5, %s656_s7  ;;  %p660_p4 = scmp.lt.u32.totalorder %s656_s7, %s807_s5 }
 0x247   :  { %p662_p5 = pnand %p660_p4, %p657_p3 }
 0x249   :  { %665 = shalt.err (!%p662_p5)
}
 0x24a   :  { %s682_s12 = smov 128   ;;  %s683_s13 = smov 8  }
 0x24b   :  { %410 = dma.vmem_to_hbm [thread:$0]  %s405_s28, 512, %s807_s5, [#allocation5], %s682_s12, %s682_s12, %s683_s13  }
 0x24c   :  { %672 = dma.done.wait [#allocation5], 512  }
 0x24d   :  { %673 = vsyncadd [#allocation5], 4294966784 }
 0x24e   :  { %414 = vsyncpa [#allocation4], 1 }
 0x24f   :  { %415 = vsyncpa [#allocation7], 1 }
 0x250   :  { %416 = vsyncpa [#allocation10], 1 }
 0x251   :  { %417 = vsyncpa [#allocation5], 1 }

</bundles_post_ra>
